<compile_context>
chip_gen: v7x
topology: tpu7x:2x2x1
jax: 0.10.0
libtpu: 0.0.40
codegen_flags: <defaults>
</compile_context>

<pallas_src>
import functools

import jax
import jax.numpy as jnp
from jax import lax
from jax.experimental import pallas as pl
from jax.experimental.pallas import tpu as pltpu

_LANE = 128      # lane width (last dim) alignment
_SUBLANE = 8     # f32/bf16-safe sublane multiple for batch tiles


def _round_up(n, m):
    return ((n + m - 1) // m) * m


def _pad_cols(a, n_pad):
    n = a.shape[-1]
    if n == n_pad:
        return a
    return jnp.pad(a, [(0, 0)] * (a.ndim - 1) + [(0, n_pad - n)])


def _pad_rows(a, m_pad):
    m = a.shape[0]
    if m == m_pad:
        return a
    return jnp.pad(a, [(0, m_pad - m)] + [(0, 0)] * (a.ndim - 1))


# ------------------------- Pallas kernels -------------------------

def _affine_kernel(x_ref, w_ref, b_ref, out_ref):
    """forward_feat: out = x @ W1 + b1 (lane-dense padded output)."""
    y = jnp.dot(x_ref[...], w_ref[...],
                preferred_element_type=jnp.float32) + b_ref[...]
    out_ref[...] = y.astype(out_ref.dtype)


def _affine_sigmoid_kernel(x_ref, w_ref, b_ref, out_ref):
    """Folded head path: out = sigmoid(x @ (W1@W2) + (b1@W2 + b2)).

    Output block spans the full (unpadded) head width -> minimal writeback.
    """
    y = jnp.dot(x_ref[...], w_ref[...],
                preferred_element_type=jnp.float32) + b_ref[...]
    out_ref[...] = jax.nn.sigmoid(y).astype(out_ref.dtype)


def _dual_kernel(split, x_ref, w_ref, b_ref, out_ref):
    """One wide matmul -> one wide output slab [feat_pad | head].

    Columns [:split] are the (padded) feature output, columns [split:] are the
    sigmoid head output.  A column mask selects sigmoid vs identity so a single
    full-width store is emitted (no in-kernel slicing, one writeback stream).
    """
    y = jnp.dot(x_ref[...], w_ref[...],
                preferred_element_type=jnp.float32) + b_ref[...]
    col = lax.broadcasted_iota(jnp.int32, y.shape, 1)
    out = jnp.where(col < split, y, jax.nn.sigmoid(y))
    out_ref[...] = out.astype(out_ref.dtype)


# ------------------------- pallas_call launcher -------------------------

def _run_padded(kernel, x_p, w_p, b_p, n_out, tile_b, out_dtype):
    """Launch `kernel` over a batch grid; weights/bias resident across steps."""
    b_pad, k_pad = x_p.shape
    n_w = w_p.shape[1]
    grid = (b_pad // tile_b,)

    return pl.pallas_call(
        kernel,
        out_shape=jax.ShapeDtypeStruct((b_pad, n_out), out_dtype),
        grid=grid,
        in_specs=[
            pl.BlockSpec((tile_b, k_pad), lambda i: (i, 0)),   # x: tiled over batch
            pl.BlockSpec((k_pad, n_w), lambda i: (0, 0)),      # weights: resident
            pl.BlockSpec((1, n_w), lambda i: (0, 0)),          # bias (f32): resident
        ],
        out_specs=pl.BlockSpec((tile_b, n_out), lambda i: (i, 0)),
        compiler_params=pltpu.CompilerParams(
            dimension_semantics=("parallel",)),
    )(x_p, w_p, b_p)


def _batch_tiling(B, tile_b):
    """Minimal-padding batch tiling; >= 2 grid steps when possible (v7x megacore)."""
    n_steps = max(pl.cdiv(B, tile_b), 1)
    if B >= 2 * _SUBLANE:
        n_steps = max(n_steps, 2)          # keep both TensorCores busy on v7x
    tile = _round_up(pl.cdiv(B, n_steps), _SUBLANE)
    b_pad = _round_up(B, tile)
    return tile, b_pad


def _prep_x(x, b_pad, k_pad, compute_dtype):
    B, k = x.shape
    return jnp.pad(x, ((0, b_pad - B), (0, k_pad - k))).astype(compute_dtype)


# ------------------------- one-time parameter preparation -------------------------

def prepare_params(w1, b1, w2=None, b2=None, *, compute_dtype=jnp.bfloat16):
    """Hoisted weight preprocessing: fold, pad, concat, cast -- done once.

    Weights are (in_features, out_features) (pre-transposed vs. nn.Linear),
    biases are (1, out_features).  The head fold
        sigmoid((x@W1+b1)@W2+b2) == sigmoid(x@(W1@W2) + (b1@W2+b2))
    is valid because there is no nonlinearity between self.model and self.fc.
    The fold is computed in f32; only the result is cast to bf16.  Biases stay f32.
    """
    in_size, ftdim = w1.shape
    k_pad = _round_up(in_size, _LANE)
    ft_pad = _round_up(ftdim, _LANE)

    w1_pp = _pad_rows(_pad_cols(w1, ft_pad), k_pad)        # (k_pad, ft_pad), f32
    params = dict(
        in_size=in_size, ftdim=ftdim, k_pad=k_pad, ft_pad=ft_pad,
        compute_dtype=compute_dtype,
        w1=w1_pp.astype(compute_dtype),
        b1=_pad_cols(b1, ft_pad).astype(jnp.float32),
    )

    if w2 is not None:
        head_out = w2.shape[1]
        w12 = jnp.dot(w1, w2)                              # fold in f32
        b12 = (jnp.dot(b1, w2) + b2).astype(jnp.float32)
        params.update(
            head_out=head_out,
            w12=_pad_rows(w12, k_pad).astype(compute_dtype),     # (k_pad, head_out)
            b12=b12,                                             # (1, head_out)
            # dual path: one wide matmul x @ [W1_pad | W12]
            w_cat=jnp.concatenate(
                [w1_pp, _pad_rows(w12, k_pad)], axis=1).astype(compute_dtype),
            b_cat=jnp.concatenate(
                [_pad_cols(b1, ft_pad), b12], axis=1).astype(jnp.float32),
        )
    return params


# ------------------------- Python wrappers -------------------------

def neuralnet_forward(x, params, *, tile_b=1024):
    """Mirrors NeuralNet.forward: fc(model(x)) if a head was prepared, else model(x)."""
    B = x.shape[0]
    out_dtype = x.dtype
    tile, b_pad = _batch_tiling(B, tile_b)
    x_p = _prep_x(x, b_pad, params["k_pad"], params["compute_dtype"])

    if "w12" in params:
        head_out = params["head_out"]
        out = _run_padded(_affine_sigmoid_kernel, x_p, params["w12"], params["b12"],
                          head_out, tile, out_dtype)
        return out[:B]
    else:
        out = _run_padded(_affine_kernel, x_p, params["w1"], params["b1"],
                          params["ft_pad"], tile, out_dtype)
        return out[:B, :params["ftdim"]]


def neuralnet_forward_feat(x, params, *, tile_b=1024):
    """Mirrors NeuralNet.forward_feat: model(x)."""
    B = x.shape[0]
    out_dtype = x.dtype
    tile, b_pad = _batch_tiling(B, tile_b)
    x_p = _prep_x(x, b_pad, params["k_pad"], params["compute_dtype"])
    out = _run_padded(_affine_kernel, x_p, params["w1"], params["b1"],
                      params["ft_pad"], tile, out_dtype)
    return out[:B, :params["ftdim"]]


def neuralnet_forward_both(x, params, *, tile_b=1024):
    """Returns (forward(x), forward_feat(x)) from a single pallas_call / one wide matmul."""
    B = x.shape[0]
    out_dtype = x.dtype
    ft_pad, ftdim, head_out = params["ft_pad"], params["ftdim"], params["head_out"]
    tile, b_pad = _batch_tiling(B, tile_b)
    x_p = _prep_x(x, b_pad, params["k_pad"], params["compute_dtype"])

    kernel = functools.partial(_dual_kernel, ft_pad)
    wide = _run_padded(kernel, x_p, params["w_cat"], params["b_cat"],
                       ft_pad + head_out, tile, out_dtype)
    return wide[:B, ft_pad:ft_pad + head_out], wide[:B, :ftdim]


def _linear_init(key, fan_in, fan_out, dtype=jnp.float32):
    """PyTorch nn.Linear default init: U(-1/sqrt(fan_in), 1/sqrt(fan_in))."""
    kw, kb = jax.random.split(key)
    bound = 1.0 / jnp.sqrt(jnp.asarray(fan_in, dtype))
    w = jax.random.uniform(kw, (fan_in, fan_out), dtype, -bound, bound)
    b = jax.random.uniform(kb, (1, fan_out), dtype, -bound, bound)
    return w, b


# ------------------------- Reference (plain JAX, f32) -------------------------

def _reference_forward(x, w1, b1, w2, b2):
    feat = x @ w1 + b1
    return jax.nn.sigmoid(feat @ w2 + b2)


if __name__ == "__main__":
    # Small shapes consistent with the module: batch=8, in_size=32, ftdim=64, head_out=4
    B, IN_SIZE, FTDIM, HEAD_OUT = 8, 32, 64, 4

    key = jax.random.PRNGKey(0)
    kx, k1, k2 = jax.random.split(key, 3)

    x = jax.random.normal(kx, (B, IN_SIZE), jnp.float32)
    w1, b1 = _linear_init(k1, IN_SIZE, FTDIM)       # self.model = Linear(in_size, ftdim)
    w2, b2 = _linear_init(k2, FTDIM, HEAD_OUT)      # self.fc = head (Linear + Sigmoid)

    # One-time weight preparation (hoisted out of the per-call path).
    head_params = prepare_params(w1, b1, w2, b2)    # module with fc head
    feat_params = prepare_params(w1, b1)            # module with fc = None

    fwd_head = jax.jit(lambda xx: neuralnet_forward(xx, head_params))
    fwd_feat = jax.jit(lambda xx: neuralnet_forward(xx, feat_params))
    fwd_both = jax.jit(lambda xx: neuralnet_forward_both(xx, head_params))

    out = jax.block_until_ready(fwd_head(x))                 # forward(x) with head
    feat = jax.block_until_ready(fwd_feat(x))                # forward(x) with fc=None
    out2, feat2 = jax.block_until_ready(fwd_both(x))         # both from one launch

    # correctness checks against plain-JAX f32 reference (bf16 operands -> loose tol)
    ref_out = _reference_forward(x, w1, b1, w2, b2)
    ref_feat = x @ w1 + b1
    assert out.shape == (B, HEAD_OUT) and feat.shape == (B, FTDIM)
    assert out2.shape == (B, HEAD_OUT) and feat2.shape == (B, FTDIM)
    assert jnp.allclose(out, ref_out, atol=3e-2, rtol=3e-2)
    assert jnp.allclose(feat, ref_feat, atol=3e-2, rtol=3e-2)
    assert jnp.allclose(out2, ref_out, atol=3e-2, rtol=3e-2)
    assert jnp.allclose(feat2, ref_feat, atol=3e-2, rtol=3e-2)

    # TODO(synk): training members (SGD step, BCELoss, change_lr) are not part of
    # forward() and are intentionally not implemented as kernels.
    print("KERNEL_OK")
</pallas_src>

<mosaic_0001>
module attributes {stable_mosaic.version = 11 : i64} {
  func.func @_affine_sigmoid_kernel(%arg0: i32, %arg1: memref<8x128xbf16, #tpu.memory_space<vmem>>, %arg2: memref<128x4xbf16, #tpu.memory_space<vmem>>, %arg3: memref<1x4xf32, #tpu.memory_space<vmem>>, %arg4: memref<8x4xf32, #tpu.memory_space<vmem>>) attributes {dimension_semantics = [#tpu.dimension_semantics<parallel>], iteration_bounds = array<i64: 1>, scalar_prefetch = 0 : i64, scratch_operands = 0 : i64, tpu.core_type = #tpu.core_type<tc>, window_params = [{transform_indices = @transform_0, window_bounds = array<i64: 8, 128>}, {pipeline_mode = #tpu.pipeline_mode<synchronous>, transform_indices = @transform_1, window_bounds = array<i64: 128, 4>}, {pipeline_mode = #tpu.pipeline_mode<synchronous>, transform_indices = @transform_2, window_bounds = array<i64: 1, 4>}, {transform_indices = @transform_3, window_bounds = array<i64: 8, 4>}]} {
    %c0 = arith.constant 0 : index
    %c0_0 = arith.constant 0 : index
    %0 = vector.load %arg1[%c0, %c0_0] : memref<8x128xbf16, #tpu.memory_space<vmem>>, vector<8x128xbf16>
    %c0_1 = arith.constant 0 : index
    %c0_2 = arith.constant 0 : index
    %1 = vector.load %arg2[%c0_1, %c0_2] : memref<128x4xbf16, #tpu.memory_space<vmem>>, vector<128x4xbf16>
    %cst = arith.constant dense<0.000000e+00> : vector<8x4xf32>
    %2 = tpu.matmul %0, %1, %cst {dimension_numbers = #tpu.dot_dimension_numbers<[1], [0], [0], [1], [0, 0, 1, 1], [], []>} : vector<8x128xbf16>, vector<128x4xbf16>, vector<8x4xf32> -> vector<8x4xf32>
    %c0_3 = arith.constant 0 : index
    %c0_4 = arith.constant 0 : index
    %3 = vector.load %arg3[%c0_3, %c0_4] : memref<1x4xf32, #tpu.memory_space<vmem>>, vector<1x4xf32>
    %4 = vector.broadcast %3 : vector<1x4xf32> to vector<8x4xf32>
    %5 = arith.addf %2, %4 : vector<8x4xf32>
    %6 = arith.negf %5 : vector<8x4xf32>
    %7 = math.exp %6 : vector<8x4xf32>
    %cst_5 = arith.constant 1.000000e+00 : f32
    %8 = vector.broadcast %cst_5 : f32 to vector<8x4xf32>
    %9 = arith.addf %8, %7 : vector<8x4xf32>
    %10 = arith.divf %8, %9 : vector<8x4xf32>
    %c0_6 = arith.constant 0 : index
    %c0_7 = arith.constant 0 : index
    %11 = vector.load %arg4[%c0_6, %c0_7] : memref<8x4xf32, #tpu.memory_space<vmem>>, vector<8x4xf32>
    tpu.vector_store %arg4[%c0_6, %c0_7], %10 {strides = array<i32>} : memref<8x4xf32, #tpu.memory_space<vmem>>, vector<8x4xf32>,
    return
  }
  func.func @transform_0(%arg0: i32) -> (i32, i32) {
    %c0_i32 = arith.constant 0 : i32
    %c0_i32_0 = arith.constant 0 : i32
    return %arg0, %c0_i32 : i32, i32
  }
  func.func @transform_1(%arg0: i32) -> (i32, i32) {
    %c0_i32 = arith.constant 0 : i32
    %c0_i32_0 = arith.constant 0 : i32
    %c0_i32_1 = arith.constant 0 : i32
    return %c0_i32, %c0_i32_0 : i32, i32
  }
  func.func @transform_2(%arg0: i32) -> (i32, i32) {
    %c0_i32 = arith.constant 0 : i32
    %c0_i32_0 = arith.constant 0 : i32
    %c0_i32_1 = arith.constant 0 : i32
    return %c0_i32, %c0_i32_0 : i32, i32
  }
  func.func @transform_3(%arg0: i32) -> (i32, i32) {
    %c0_i32 = arith.constant 0 : i32
    %c0_i32_0 = arith.constant 0 : i32
    return %arg0, %c0_i32 : i32, i32
  }
}

</mosaic_0001>

<bundles_post_ra>
// kernel: _lambda_.1
= control target key start
LH: loop header
LB: loop body
LE: loop exit
PB: predicated region body
PF: predicated region fallthrough
CT: control target
= control target key end

     0   :  { %8 = vsyncpa [#allocation3], 0  ;;  %s234_s12 = smov [#allocation2]   ;;  %s280_s0 = inlined_call_operand.vmem [shape: bf16[8,128], index: 0, kind: input, shape index: {}]   ;;  %s281_s1 = inlined_call_operand.hbm [shape: bf16[128,4], index: 1, kind: input, shape index: {}]   ;;  %s282_s2 = inlined_call_operand.vmem [shape: f32[1,4], index: 2, kind: input, shape index: {}]   ;;  %s283_s3 = inlined_call_operand.vmem [shape: f32[8,4], index: 3, kind: output, shape index: {}]  }
   0x1   :  { %s16_s13 = sshll.u32 %s234_s12, 4  ;;  %s210_s16 = scalar_lea.hbm %s281_s1, 1024  ;;  %s17_s13 = int_to_ptr.vmem [resolvable:$true] %s16_s13 }
   0x2   :  { %p211_p0 = scmp.ne.s32.totalorder %s281_s1, %s210_s16  ;;  %p214_p1 = scmp.lt.u32.totalorder %s210_s16, %s281_s1 }
   0x4   :  { %p216_p2 = pnand %p214_p1, %p211_p0 }
   0x6   :  { %219 = shalt.err (!%p216_p2)
}
   0x7   :  { %s220_s21 = scalar_lea.vmem %s17_s13, 1024  ;;  %p225_p4 = scmp.lt.s32.totalorder %s17_s13, %s17_s13 }
   0x8   :  { %p221_p3 = scmp.ne.s32.totalorder %s17_s13, %s220_s21  ;;  %p226_p5 = scmp.lt.s32.totalorder %s220_s21, %s220_s21 }
   0xa   :  { %p227_p6 = por %p226_p5, %p225_p4 }
   0xc   :  { %p228_p7 = pnand %p227_p6, %p221_p3 }
   0xe   :  { %231 = shalt.err (!%p228_p7)
}
   0xf   :  { %s235_s22 = smov 64   ;;  %s236_s23 = smov 4  }
  0x10   :  { %22 = dma.hbm_to_vmem [thread:$0]  %s281_s1, 1024, %s17_s13, [#allocation3], %s235_s22, %s235_s22, %s236_s23  }
  0x11   :  { %232 = dma.done.wait [#allocation3], 1024  }
  0x12   :  { %233 = vsyncadd [#allocation3], 4294966272  ;;  %v237_v0 = vmov 0.0   ;;  %vm238_vm0 = vmmov 0   ;;  %v198_v1 = vld [vmem:[#allocation2] sm:$0xff]   ;;  %v199_v2 = vld [vmem:[#allocation2 + $0x8] sm:$0xff]  }
  0x13   :  { %173 = vmatprep.subr.bf16.mxu0 %v237_v0  ;;  %189 = vmatprep.mubr.msk.bf16.mxu0 %vm238_vm0, %v237_v0  ;;  %v200_v3 = vld [vmem:[#allocation2 + $0x10] sm:$0xff]   ;;  %v201_v4 = vld [vmem:[#allocation2 + $0x18] sm:$0xff]   ;;  %v202_v5 = vld [vmem:[#allocation2 + $0x20] sm:$0xff]   ;;  %vm147_vm1 = vcmask 31744  }
  0x14   :  { %174 = vmatpush3.bf16.msra.mxu0 %v198_v1  ;;  %v203_v6 = vld [vmem:[#allocation2 + $0x28] sm:$0xff]   ;;  %v204_v7 = vld [vmem:[#allocation2 + $0x30] sm:$0xff]   ;;  %v205_v8 = vld [vmem:[#allocation2 + $0x38] sm:$0xff]  }
  0x15   :  { %175 = vmatprep.subr.bf16.mxu0 %v237_v0  ;;  %v29_v9 = vld [vmem:[%s280_s0] sm:$0xf] }
  0x16   :  { %v154_v10 = vld [vmem:[%s282_s2] ss:$0 sm:$0xff] }
  0x18   :  { %176 = vmatpush3.bf16.msra.mxu0 %v199_v2 }
  0x19   :  { %177 = vmatprep.subr.bf16.mxu0 %v237_v0 }
  0x1c   :  { %178 = vmatpush3.bf16.msra.mxu0 %v200_v3 }
  0x1d   :  { %179 = vmatprep.subr.bf16.mxu0 %v237_v0 }
  0x20   :  { %180 = vmatpush3.bf16.msra.mxu0 %v201_v4 }
  0x21   :  { %181 = vmatprep.subr.bf16.mxu0 %v237_v0 }
  0x24   :  { %182 = vmatpush3.bf16.msra.mxu0 %v202_v5 }
  0x25   :  { %183 = vmatprep.subr.bf16.mxu0 %v237_v0 }
  0x28   :  { %184 = vmatpush3.bf16.msra.mxu0 %v203_v6 }
  0x29   :  { %185 = vmatprep.subr.bf16.mxu0 %v237_v0 }
  0x2c   :  { %186 = vmatpush3.bf16.msra.mxu0 %v204_v7 }
  0x2d   :  { %187 = vmatprep.subr.bf16.mxu0 %v237_v0 }
  0x30   :  { %188 = vmatpush3.bf16.msra.mxu0 %v205_v8 }
  0x33   :  { %190 = vmatmul.mubr.bf16.vlgmr.msra.gmra.mrb[0].mxu0 %v29_v9 }
 0x106   :  { %v135_v11 = vpop.f32.mrb[0].mxu0 }
 0x107   :  { %v136_v12 = vadd.f32 %v154_v10, %v135_v11  ;;  %v191_v13 = vpop.f32.mrb[1].mxu0 }
 0x108   :  { %v138_v14 = vpop.f32.mrb[2].mxu0 }
 0x109   :  { %v163_v15 = vmul.f32 -1.442695, %v136_v12  ;;  %v192_v16 = vpop.f32.mrb[3].mxu0 }
 0x10b   :  { %206 = vpow2.f32 %v163_v15 }
 0x115   :  { %v207_v17 = vpop.eup %206 }
 0x116   :  { %v144_v18 = vadd.f32 1.0, %v207_v17 }
 0x118   :  { %208 = vrcp.f32 %v144_v18 }
 0x122   :  { %v209_v19 = vpop.eup %208 }
 0x123   :  { %148 = vst.msk [vmem:[%s283_s3] sm:$0xff] %vm147_vm1, %v209_v19 }
 0x124   :  { %153 = vsyncpa [#allocation3], 1 }

</bundles_post_ra>
